<compile_context>
chip_gen: v6e
topology: v6e:2x2x1
jax: 0.10.0
libtpu: 0.0.40
codegen_flags: <defaults>
</compile_context>

<pallas_src>
import math

import jax
import jax.numpy as jnp
from jax.experimental import pallas as pl
from jax.experimental.pallas import tpu as pltpu


def build_pe_table(d_model: int, tau: float = 10000.0, max_len: int = 397,
                   dtype=jnp.float32):
    """Deterministic sin/cos table, identical construction to the torch __init__."""
    pe = jnp.zeros((max_len + 1, d_model), dtype=dtype)
    position = jnp.arange(0, max_len, dtype=dtype)[:, None]          # [max_len, 1]
    div_term = jnp.exp(
        jnp.arange(0, d_model, 2, dtype=dtype) * (-math.log(tau) / d_model)
    )                                                                 # [d_model//2]
    pe = pe.at[1:, 0::2].set(jnp.sin(position * div_term))
    pe = pe.at[1:, 1::2].set(jnp.cos(position * div_term))
    return pe


def _gather_kernel(pos_ref, table_ref, out_ref):
    # pos_ref:   (TN, 1)   int32  -- this step's tile of (clamped) positions, in VMEM
    # table_ref: (R,  D)   f32    -- full PE table, resident in VMEM (same block every step)
    # out_ref:   (TN, D)   f32    -- gathered rows for this tile
    idx = pos_ref[...]                                   # (TN, 1)
    tbl = table_ref[...]                                 # (R, D)
    tn = idx.shape[0]
    n_rows = tbl.shape[0]

    # Vectorized gather: one-hot(positions) @ table.
    # Each row of `onehot` has exactly one 1.0, so with HIGHEST precision the
    # matmul reproduces the table row exactly (0*x terms contribute exact zeros).
    row_ids = jax.lax.broadcasted_iota(jnp.int32, (tn, n_rows), 1)   # (TN, R)
    onehot = (idx == row_ids).astype(tbl.dtype)                      # (TN, R)
    out_ref[...] = jnp.dot(
        onehot, tbl,
        preferred_element_type=jnp.float32,
        precision=jax.lax.Precision.HIGHEST,
    ).astype(out_ref.dtype)


def positional_encoding_lookup(table: jax.Array, positions: jax.Array, *,
                               block_positions: int = 512) -> jax.Array:
    """out = table[positions]  -> positions.shape + (d_model,), like nn.Embedding."""
    n_rows, d_model = table.shape
    pos_flat = positions.reshape(-1).astype(jnp.int32)
    # Defensive clamp: an OOB position would otherwise gather all-zeros silently.
    pos_flat = jnp.clip(pos_flat, 0, n_rows - 1)
    n = pos_flat.shape[0]

    if n == 0:
        return jnp.zeros(positions.shape + (d_model,), table.dtype)

    # Adaptive tile size: round the flattened count up to a sublane multiple (8)
    # so small inputs run as a single right-sized tile; cap at block_positions.
    tn = min(block_positions, ((n + 7) // 8) * 8)
    num_tiles = pl.cdiv(n, tn)
    n_pad = num_tiles * tn
    # Padding rows use index 0 (the all-zeros padding row); sliced off below.
    pos_padded = jnp.pad(pos_flat, (0, n_pad - n)).reshape(n_pad, 1)

    out = pl.pallas_call(
        _gather_kernel,
        out_shape=jax.ShapeDtypeStruct((n_pad, d_model), table.dtype),
        grid_spec=pltpu.PrefetchScalarGridSpec(
            num_scalar_prefetch=0,
            grid=(num_tiles,),
            in_specs=[
                # Positions tile for this step (VMEM, used vectorized in-kernel).
                pl.BlockSpec((tn, 1), lambda i: (i, 0)),
                # Full table, constant block index -> DMA'd once, stays resident.
                pl.BlockSpec((n_rows, d_model), lambda i: (0, 0)),
            ],
            out_specs=pl.BlockSpec((tn, d_model), lambda i: (i, 0)),
        ),
        compiler_params=pltpu.CompilerParams(
            # Independent output tiles -> shardable across v7x's two TensorCores.
            dimension_semantics=("parallel",),
        ),
    )(pos_padded, table)

    return out[:n].reshape(positions.shape + (d_model,))


if __name__ == "__main__":
    d_model = 32
    tau = 10000.0
    max_len = 397

    table = build_pe_table(d_model, tau, max_len)                    # [398, 32]

    key = jax.random.PRNGKey(0)
    k1, k2 = jax.random.split(key)

    # Small case matching the module's typical use: [batch=2, seq=8] -> one 16-row tile.
    positions_small = jax.random.randint(k1, (2, 8), 0, max_len + 1, dtype=jnp.int32)
    out_small = jax.block_until_ready(positional_encoding_lookup(table, positions_small))
    ref_small = jnp.take(table, positions_small, axis=0)
    assert out_small.shape == (2, 8, d_model), out_small.shape
    assert out_small.dtype == jnp.float32, out_small.dtype
    assert jnp.allclose(out_small, ref_small, atol=1e-5, rtol=1e-5), \
        "kernel output mismatch vs reference lookup (small)"

    # Larger case: multiple grid tiles + ragged final tile (800 positions, TN=512).
    positions_big = jax.random.randint(k2, (4, 200), 0, max_len + 1, dtype=jnp.int32)
    out_big = jax.block_until_ready(positional_encoding_lookup(table, positions_big))
    ref_big = jnp.take(table, positions_big, axis=0)
    assert out_big.shape == (4, 200, d_model), out_big.shape
    assert jnp.allclose(out_big, ref_big, atol=1e-5, rtol=1e-5), \
        "kernel output mismatch vs reference lookup (large/ragged)"

    print("KERNEL_OK")
</pallas_src>

<mosaic_0001>
module attributes {stable_mosaic.version = 11 : i64} {
  func.func @_gather_kernel(%arg0: i32, %arg1: memref<16x1xi32, #tpu.memory_space<vmem>>, %arg2: memref<398x32xf32, #tpu.memory_space<vmem>>, %arg3: memref<16x32xf32, #tpu.memory_space<vmem>>) attributes {dimension_semantics = [#tpu.dimension_semantics<parallel>], iteration_bounds = array<i64: 1>, scalar_prefetch = 0 : i64, scratch_operands = 0 : i64, tpu.core_type = #tpu.core_type<tc>, window_params = [{transform_indices = @transform_0, window_bounds = array<i64: 16, 1>}, {pipeline_mode = #tpu.pipeline_mode<synchronous>, transform_indices = @transform_1, window_bounds = array<i64: 398, 32>}, {transform_indices = @transform_2, window_bounds = array<i64: 16, 32>}]} {
    %c0 = arith.constant 0 : index
    %c0_0 = arith.constant 0 : index
    %0 = vector.load %arg1[%c0, %c0_0] : memref<16x1xi32, #tpu.memory_space<vmem>>, vector<16x1xi32>
    %c0_1 = arith.constant 0 : index
    %c0_2 = arith.constant 0 : index
    %1 = vector.load %arg2[%c0_1, %c0_2] : memref<398x32xf32, #tpu.memory_space<vmem>>, vector<398x32xf32>
    %2 = tpu.iota {dimensions = array<i32: 1>} : vector<16x398xi32>
    %3 = vector.broadcast %0 : vector<16x1xi32> to vector<16x398xi32>
    %4 = arith.cmpi eq, %3, %2 : vector<16x398xi32>
    %5 = arith.extui %4 : vector<16x398xi1> to vector<16x398xi32>
    %6 = arith.sitofp %5 : vector<16x398xi32> to vector<16x398xf32>
    %cst = arith.constant dense<0.000000e+00> : vector<16x32xf32>
    %7 = tpu.matmul %6, %1, %cst {dimension_numbers = #tpu.dot_dimension_numbers<[1], [0], [0], [1], [0, 0, 1, 1], [], []>, precision = #tpu.contract_precision<fp32>} : vector<16x398xf32>, vector<398x32xf32>, vector<16x32xf32> -> vector<16x32xf32>
    %c0_3 = arith.constant 0 : index
    %c0_4 = arith.constant 0 : index
    %8 = vector.load %arg3[%c0_3, %c0_4] : memref<16x32xf32, #tpu.memory_space<vmem>>, vector<16x32xf32>
    tpu.vector_store %arg3[%c0_3, %c0_4], %7 {strides = array<i32>} : memref<16x32xf32, #tpu.memory_space<vmem>>, vector<16x32xf32>,
    return
  }
  func.func @transform_0(%arg0: i32) -> (i32, i32) {
    %c0_i32 = arith.constant 0 : i32
    %c0_i32_0 = arith.constant 0 : i32
    return %arg0, %c0_i32 : i32, i32
  }
  func.func @transform_1(%arg0: i32) -> (i32, i32) {
    %c0_i32 = arith.constant 0 : i32
    %c0_i32_0 = arith.constant 0 : i32
    %c0_i32_1 = arith.constant 0 : i32
    return %c0_i32, %c0_i32_0 : i32, i32
  }
  func.func @transform_2(%arg0: i32) -> (i32, i32) {
    %c0_i32 = arith.constant 0 : i32
    %c0_i32_0 = arith.constant 0 : i32
    return %arg0, %c0_i32 : i32, i32
  }
}

</mosaic_0001>

<bundles_post_ra>
// kernel: tpu_custom_call.1
= control target key start
LH: loop header
LB: loop body
LE: loop exit
PB: predicated region body
PF: predicated region fallthrough
CT: control target
= control target key end

     0   :  { %v2072_v2 = vmov 0   ;;  %s3318_s0 = inlined_call_operand.vmem [shape: s32[16,1], index: 0, kind: input, shape index: {}]   ;;  %s3319_s1 = inlined_call_operand.vmem [shape: f32[398,32], index: 1, kind: input, shape index: {}]   ;;  %s3320_s2 = inlined_call_operand.hbm [shape: f32[16,32], index: 2, kind: output, shape index: {}]  }
   0x1   :  { %v12_v0 = vld [vmem:[%s3318_s0] sm:$0xff]  ;;  %v45_v1 = vld [vmem:[%s3319_s1 + $0xf8] sm:$0xff]  ;;  %2049 = vset.pattern.permute.xlu0 %v2072_v2  ;;  %v44_v5 = vld [vmem:[%s3319_s1 + $0xf0] sm:$0xff] }
   0x2   :  { %v2099_v3 = vand.u32 4294901760, %v45_v1  ;;  %v29_v4 = vld [vmem:[%s3319_s1 + $0x78] sm:$0xff]  ;;  %v28_v6 = vld [vmem:[%s3319_s1 + $0x70] sm:$0xff]  ;;  %70 = vperm.xlu0 %2049, %v12_v0   ;;  %v2112_v8 = vand.u32 4294901760, %v44_v5  ;;  %v43_v10 = vld [vmem:[%s3319_s1 + $0xe8] sm:$0xff] }
   0x3   :  { %v2110_v7 = vand.u32 4294901760, %v29_v4  ;;  %v2114_v9 = vand.u32 4294901760, %v28_v6  ;;  %v27_v11 = vld [vmem:[%s3319_s1 + $0x68] sm:$0xff]  ;;  %v42_v12 = vld [vmem:[%s3319_s1 + $0xe0] sm:$0xff]  ;;  %v2131_v15 = vand.u32 4294901760, %v43_v10  ;;  %v41_v39 = vld [vmem:[%s3319_s1 + $0xd8] sm:$0xff] }
   0x4   :  { %v13_v13 = vld [vmem:[%s3318_s0 + $0x8] sm:$0xff]  ;;  %v2129_v14 = vsub.f32 %v45_v1, %v2099_v3  ;;  %v2133_v16 = vand.u32 4294901760, %v27_v11  ;;  %v2135_v17 = vand.u32 4294901760, %v42_v12  ;;  %v26_v18 = vld [vmem:[%s3319_s1 + $0x60] sm:$0xff]  ;;  %1815 = vmatprep.subr.mxu0 %v2099_v3  ;;  %v2145_v20 = vsub.f32 %v44_v5, %v2112_v8  ;;  %v25_v44 = vld [vmem:[%s3319_s1 + $0x58] sm:$0xff] }
   0x5   :  { %v2142_v19 = vsub.f32 %v29_v4, %v2110_v7  ;;  %v2148_v21 = vsub.f32 %v28_v6, %v2114_v9  ;;  %v2150_v22 = vand.u32 4294901760, %v26_v18  ;;  %1816 = vmatpush3.msra.mxu0 %v2110_v7  ;;  %v2155_v24 = vsub.f32 %v43_v10, %v2131_v15  ;;  %v40_v45 = vld [vmem:[%s3319_s1 + $0xd0] sm:$0xff]  ;;  %v39_v51 = vld [vmem:[%s3319_s1 + $0xc8] sm:$0xff]  ;;  %v38_v53 = vld [vmem:[%s3319_s1 + $0xc0] sm:$0xff] }
   0x6   :  { %3405 = vst [vmem:[#allocation5_spill] sm:$0xff] %v2129_v14  ;;  %v3342_v23 = vand.u32 4294901760, %v2129_v14  ;;  %v2158_v25 = vsub.f32 %v27_v11, %v2133_v16  ;;  %v2161_v26 = vsub.f32 %v42_v12, %v2135_v17  ;;  %1817 = vmatprep.subr.mxu0 %v2112_v8  ;;  %73 = vperm.xlu0 %2049, %v13_v13   ;;  %v3338_v28 = vand.u32 4294901760, %v2145_v20  ;;  %v24_v46 = vld [vmem:[%s3319_s1 + $0x50] sm:$0xff]  ;;  %v23_v52 = vld [vmem:[%s3319_s1 + $0x48] sm:$0xff]  ;;  %v22_v58 = vld [vmem:[%s3319_s1 + $0x40] sm:$0xff] }
   0x7   :  { %v3340_v27 = vand.u32 4294901760, %v2142_v19  ;;  %v3334_v29 = vand.u32 4294901760, %v2148_v21  ;;  %v2168_v30 = vsub.f32 %v26_v18, %v2150_v22  ;;  %1818 = vmatpush3.msra.mxu0 %v2114_v9  ;;  %v3333_v32 = vand.u32 4294901760, %v2155_v24 }
   0x8   :  { %v353_v31 = vsub.f32 %v2129_v14, %v3342_v23  ;;  %v3331_v33 = vand.u32 4294901760, %v2158_v25  ;;  %v3330_v34 = vand.u32 4294901760, %v2161_v26  ;;  %1819 = vmatprep.subr.mxu0 %v2131_v15  ;;  %v360_v36 = vsub.f32 %v2145_v20, %v3338_v28 }
   0x9   :  { %v241_v35 = vsub.f32 %v2142_v19, %v3340_v27  ;;  %v248_v37 = vsub.f32 %v2148_v21, %v3334_v29  ;;  %v3329_v38 = vand.u32 4294901760, %v2168_v30  ;;  %1820 = vmatpush3.msra.mxu0 %v2133_v16  ;;  %v367_v41 = vsub.f32 %v2155_v24, %v3333_v32 }
   0xa   :  { %v354_v40 = vand.u32 4294901760, %v353_v31  ;;  %v255_v42 = vsub.f32 %v2158_v25, %v3331_v33  ;;  %v374_v43 = vsub.f32 %v2161_v26, %v3330_v34  ;;  %1821 = vmatprep.subr.mxu0 %v2135_v17  ;;  %v361_v48 = vand.u32 4294901760, %v360_v36 }
   0xb   :  { %v242_v47 = vand.u32 4294901760, %v241_v35  ;;  %v249_v49 = vand.u32 4294901760, %v248_v37  ;;  %v262_v50 = vsub.f32 %v2168_v30, %v3329_v38  ;;  %1822 = vmatpush3.msra.mxu0 %v2150_v22  ;;  %v368_v54 = vand.u32 4294901760, %v367_v41 }
   0xc   :  { %1853 = vmatprep.subr.mxu1 %v354_v40  ;;  %v256_v55 = vand.u32 4294901760, %v255_v42  ;;  %v375_v56 = vand.u32 4294901760, %v374_v43  ;;  %v2224_v57 = vand.u32 4294901760, %v41_v39  ;;  %v2229_v60 = vand.u32 4294901760, %v25_v44 }
   0xd   :  { %1854 = vmatpush3.msra.mxu1 %v242_v47  ;;  %v263_v59 = vand.u32 4294901760, %v262_v50  ;;  %v2231_v61 = vand.u32 4294901760, %v40_v45  ;;  %v2233_v62 = vand.u32 4294901760, %v24_v46 }
   0xe   :  { %7 = vsyncpa [#allocation3], 0  ;;  %1855 = vmatprep.subr.mxu1 %v361_v48  ;;  %v2236_v63 = vsub.f32 %v41_v39, %v2224_v57  ;;  %v2238_v0 = vand.u32 4294901760, %v39_v51  ;;  %v2240_v1 = vand.u32 4294901760, %v23_v52  ;;  %v2242_v2 = vand.u32 4294901760, %v38_v53  ;;  %1823 = vmatprep.subr.mxu0 %v2224_v57  ;;  %v37_v47 = vld [vmem:[%s3319_s1 + $0xb8] sm:$0xff] }
   0xf   :  { %1856 = vmatpush3.msra.mxu1 %v249_v49  ;;  %v2246_v4 = vsub.f32 %v25_v44, %v2229_v60  ;;  %v2249_v5 = vsub.f32 %v40_v45, %v2231_v61  ;;  %v2252_v6 = vsub.f32 %v24_v46, %v2233_v62  ;;  %v2254_v10 = vand.u32 4294901760, %v22_v58  ;;  %1824 = vmatpush3.msra.mxu0 %v2229_v60  ;;  %v33_v29 = vld [vmem:[%s3319_s1 + $0x98] sm:$0xff] }
  0x10   :  { %1857 = vmatprep.subr.mxu1 %v368_v54  ;;  %v3328_v11 = vand.u32 4294901760, %v2236_v63  ;;  %v2259_v12 = vsub.f32 %v39_v51, %v2238_v0  ;;  %v2262_v13 = vsub.f32 %v23_v52, %v2240_v1  ;;  %v2265_v18 = vsub.f32 %v38_v53, %v2242_v2  ;;  %1825 = vmatprep.subr.mxu0 %v2231_v61  ;;  %v21_v52 = vld [vmem:[%s3319_s1 + $0x38] sm:$0xff]  ;;  %v36_v53 = vld [vmem:[%s3319_s1 + $0xb0] sm:$0xff] }
  0x11   :  { %1858 = vmatpush3.msra.mxu1 %v256_v55  ;;  %v3327_v31 = vand.u32 4294901760, %v2246_v4  ;;  %v3326_v35 = vand.u32 4294901760, %v2249_v5  ;;  %v3325_v36 = vand.u32 4294901760, %v2252_v6  ;;  %v2272_v37 = vsub.f32 %v22_v58, %v2254_v10  ;;  %1826 = vmatpush3.msra.mxu0 %v2233_v62  ;;  %v20_v54 = vld [vmem:[%s3319_s1 + $0x30] sm:$0xff]  ;;  %v17_v28 = vld [vmem:[%s3319_s1 + $0x18] sm:$0xff] }
  0x12   :  { %1859 = vmatprep.subr.mxu1 %v375_v56  ;;  %v381_v39 = vsub.f32 %v2236_v63, %v3328_v11  ;;  %v3323_v40 = vand.u32 4294901760, %v2259_v12  ;;  %v3322_v41 = vand.u32 4294901760, %v2262_v13  ;;  %v3321_v42 = vand.u32 4294901760, %v2265_v18  ;;  %1827 = vmatprep.subr.mxu0 %v2238_v0 }
  0x13   :  { %3406 = vst [vmem:[#allocation6_spill] sm:$0xff] %v2272_v37  ;;  %1860 = vmatpush3.msra.mxu1 %v263_v59  ;;  %v269_v43 = vsub.f32 %v2246_v4, %v3327_v31  ;;  %v388_v44 = vsub.f32 %v2249_v5, %v3326_v35  ;;  %v276_v45 = vsub.f32 %v2252_v6, %v3325_v36  ;;  %v3324_v46 = vand.u32 4294901760, %v2272_v37 }
  0x14   :  { %1828 = vmatpush3.msra.mxu0 %v2240_v1  ;;  %v382_v48 = vand.u32 4294901760, %v381_v39  ;;  %v395_v49 = vsub.f32 %v2259_v12, %v3323_v40  ;;  %v283_v50 = vsub.f32 %v2262_v13, %v3322_v41  ;;  %v402_v51 = vsub.f32 %v2265_v18, %v3321_v42  ;;  %v35_v39 = vld [vmem:[%s3319_s1 + $0xa8] sm:$0xff]  ;;  %v34_v41 = vld [vmem:[%s3319_s1 + $0xa0] sm:$0xff] }
  0x15   :  { %1829 = vmatprep.subr.mxu0 %v2242_v2  ;;  %v270_v55 = vand.u32 4294901760, %v269_v43  ;;  %v389_v56 = vand.u32 4294901760, %v388_v44  ;;  %v277_v58 = vand.u32 4294901760, %v276_v45  ;;  %v290_v59 = vsub.f32 %v2272_v37, %v3324_v46  ;;  %v19_v42 = vld [vmem:[%s3319_s1 + $0x28] sm:$0xff]  ;;  %v18_v46 = vld [vmem:[%s3319_s1 + $0x20] sm:$0xff] }
  0x16   :  { %1830 = vmatpush3.msra.mxu0 %v2254_v10  ;;  %1861 = vmatprep.subr.mxu1 %v382_v48  ;;  %v396_v43 = vand.u32 4294901760, %v395_v49  ;;  %v284_v44 = vand.u32 4294901760, %v283_v50  ;;  %v403_v45 = vand.u32 4294901760, %v402_v51  ;;  %v2328_v40 = vand.u32 4294901760, %v37_v47 }
  0x17   :  { %1862 = vmatpush3.msra.mxu1 %v270_v55  ;;  %v291_v36 = vand.u32 4294901760, %v290_v59  ;;  %v2333_v35 = vand.u32 4294901760, %v21_v52  ;;  %v2335_v31 = vand.u32 4294901760, %v36_v53  ;;  %v2337_v11 = vand.u32 4294901760, %v20_v54 }
  0x18   :  { %1863 = vmatprep.subr.mxu1 %v389_v56  ;;  %v2340_v48 = vsub.f32 %v37_v47, %v2328_v40  ;;  %v2342_v49 = vand.u32 4294901760, %v35_v39  ;;  %v2344_v50 = vand.u32 4294901760, %v19_v42  ;;  %v2346_v51 = vand.u32 4294901760, %v34_v41  ;;  %1831 = vmatprep.subr.mxu0 %v2328_v40 }
  0x19   :  { %1864 = vmatpush3.msra.mxu1 %v277_v58  ;;  %v2350_v55 = vsub.f32 %v21_v52, %v2333_v35  ;;  %v2353_v59 = vsub.f32 %v36_v53, %v2335_v31  ;;  %v2356_v56 = vsub.f32 %v20_v54, %v2337_v11  ;;  %v2358_v47 = vand.u32 4294901760, %v18_v46  ;;  %1832 = vmatpush3.msra.mxu0 %v2333_v35 }
  0x1a   :  { %3407 = vst [vmem:[#allocation7_spill] sm:$0xff] %v2340_v48  ;;  %1865 = vmatprep.subr.mxu1 %v396_v43  ;;  %v3332_v38 = vand.u32 4294901760, %v2340_v48  ;;  %v2363_v34 = vsub.f32 %v35_v39, %v2342_v49  ;;  %v2366_v58 = vsub.f32 %v19_v42, %v2344_v50  ;;  %v2369_v52 = vsub.f32 %v34_v41, %v2346_v51 }
  0x1b   :  { %3408 = vst [vmem:[#allocation8_spill] sm:$0xff] %v2350_v55  ;;  %3409 = vst [vmem:[#allocation9_spill] sm:$0xff] %v2353_v59  ;;  %1833 = vmatprep.subr.mxu0 %v2335_v31  ;;  %1866 = vmatpush3.msra.mxu1 %v284_v44  ;;  %v3335_v53 = vand.u32 4294901760, %v2350_v55  ;;  %v3336_v54 = vand.u32 4294901760, %v2353_v59  ;;  %v3337_v43 = vand.u32 4294901760, %v2356_v56  ;;  %v2376_v33 = vsub.f32 %v18_v46, %v2358_v47 }
  0x1c   :  { %3410 = vst [vmem:[#allocation10_spill] sm:$0xff] %v2356_v56  ;;  %3411 = vst [vmem:[#allocation11_spill] sm:$0xff] %v2363_v34  ;;  %1834 = vmatpush3.msra.mxu0 %v2337_v11  ;;  %1867 = vmatprep.subr.mxu1 %v403_v45  ;;  %v409_v41 = vsub.f32 %v2340_v48, %v3332_v38  ;;  %v3339_v42 = vand.u32 4294901760, %v2363_v34  ;;  %v3341_v39 = vand.u32 4294901760, %v2366_v58  ;;  %v3343_v44 = vand.u32 4294901760, %v2369_v52 }
  0x1d   :  { %3412 = vst [vmem:[#allocation12_spill] sm:$0xff] %v2366_v58  ;;  %3413 = vst [vmem:[#allocation13_spill] sm:$0xff] %v2369_v52  ;;  %1835 = vmatprep.subr.mxu0 %v2342_v49  ;;  %1868 = vmatpush3.msra.mxu1 %v291_v36  ;;  %v297_v46 = vsub.f32 %v2350_v55, %v3335_v53  ;;  %v416_v45 = vsub.f32 %v2353_v59, %v3336_v54  ;;  %v3350_v32 = vand.u32 4294901760, %v2376_v33  ;;  %vm99_vm5 = vcmask 113664  }
  0x1e   :  { %3414 = vst [vmem:[#allocation14_spill] sm:$0xff] %v2376_v33  ;;  %v304_v38 = vsub.f32 %v2356_v56, %v3337_v43  ;;  %1836 = vmatpush3.msra.mxu0 %v2344_v50  ;;  %v410_v36 = vand.u32 4294901760, %v409_v41  ;;  %v423_v53 = vsub.f32 %v2363_v34, %v3339_v42  ;;  %v311_v54 = vsub.f32 %v2366_v58, %v3341_v39  ;;  %v32_v41 = vld [vmem:[%s3319_s1 + $0x90] sm:$0xff]  ;;  %v15_v58 = vld [vmem:[%s3319_s1 + $0x8] sm:$0xff]  ;;  %v30_v34 = vld [vmem:[%s3319_s1 + $0x80] sm:$0xff] }
  0x1f   :  { %v430_v43 = vsub.f32 %v2369_v52, %v3343_v44  ;;  %v16_v42 = vld [vmem:[%s3319_s1 + $0x10] sm:$0xff]  ;;  %1837 = vmatprep.subr.mxu0 %v2346_v51  ;;  %v298_v27 = vand.u32 4294901760, %v297_v46  ;;  %v417_v39 = vand.u32 4294901760, %v416_v45  ;;  %v318_v44 = vsub.f32 %v2376_v33, %v3350_v32  ;;  %v31_v52 = vld [vmem:[%s3319_s1 + $0x88] sm:$0xff] }
  0x20   :  { %v305_v23 = vand.u32 4294901760, %v304_v38  ;;  %1838 = vmatpush3.msra.mxu0 %v2358_v47  ;;  %1869 = vmatprep.subr.mxu1 %v410_v36  ;;  %v424_v38 = vand.u32 4294901760, %v423_v53  ;;  %v312_v46 = vand.u32 4294901760, %v311_v54  ;;  %v2432_v45 = vand.u32 4294901760, %v33_v29 }
  0x21   :  { %1870 = vmatpush3.msra.mxu1 %v298_v27  ;;  %v431_v32 = vand.u32 4294901760, %v430_v43  ;;  %v2434_v33 = vand.u32 4294901760, %v17_v28  ;;  %v2436_v56 = vand.u32 4294901760, %v32_v41  ;;  %v2438_v59 = vand.u32 4294901760, %v16_v42 }
  0x22   :  { %1871 = vmatprep.subr.mxu1 %v417_v39  ;;  %v2441_v55 = vsub.f32 %v33_v29, %v2432_v45  ;;  %v2443_v48 = vand.u32 4294901760, %v31_v52  ;;  %v2445_v37 = vand.u32 4294901760, %v15_v58  ;;  %v2447_v53 = vand.u32 4294901760, %v30_v34  ;;  %1839 = vmatprep.subr.mxu0 %v2432_v45 }
  0x23   :  { %3415 = vst [vmem:[#allocation15_spill] sm:$0xff] %v2436_v56  ;;  %3416 = vst [vmem:[#allocation16_spill] sm:$0xff] %v2438_v59  ;;  %1872 = vmatpush3.msra.mxu1 %v305_v23  ;;  %v319_v27 = vand.u32 4294901760, %v318_v44  ;;  %v2451_v54 = vsub.f32 %v17_v28, %v2434_v33  ;;  %v2454_v43 = vsub.f32 %v32_v41, %v2436_v56  ;;  %1840 = vmatpush3.msra.mxu0 %v2434_v33  ;;  %v14_v44 = vld [vmem:[%s3319_s1] sm:$0xff]  ;;  %vm106_vm6 = vcmask 1045504  }
  0x24   :  { %3417 = vst [vmem:[#allocation17_spill] sm:$0xff] %v2441_v55  ;;  %3418 = vst [vmem:[#allocation18_spill] sm:$0xff] %v2443_v48  ;;  %v2457_v39 = vsub.f32 %v16_v42, %v2438_v59  ;;  %1873 = vmatprep.subr.mxu1 %v424_v38  ;;  %v3365_v29 = vand.u32 4294901760, %v2441_v55  ;;  %v2462_v36 = vsub.f32 %v31_v52, %v2443_v48  ;;  %1841 = vmatprep.subr.mxu0 %v2436_v56  ;;  %vm1764_vm10 = vcmask 261120  }
  0x25   :  { %3419 = vst [vmem:[#allocation19_spill] sm:$0xff] %v2445_v37  ;;  %3420 = vst [vmem:[#allocation20_spill] sm:$0xff] %v2447_v53  ;;  %v2465_v23 = vsub.f32 %v15_v58, %v2445_v37  ;;  %v2468_v28 = vsub.f32 %v30_v34, %v2447_v53  ;;  %1874 = vmatpush3.msra.mxu1 %v312_v46  ;;  %v3368_v42 = vand.u32 4294901760, %v2451_v54  ;;  %v3371_v41 = vand.u32 4294901760, %v2454_v43 }
  0x26   :  { %3421 = vst [vmem:[#allocation21_spill] sm:$0xff] %v2451_v54  ;;  %3422 = vst [vmem:[#allocation22_spill] sm:$0xff] %v2454_v43  ;;  %v3372_v52 = vand.u32 4294901760, %v2457_v39  ;;  %1842 = vmatpush3.msra.mxu0 %v2438_v59  ;;  %1875 = vmatprep.subr.mxu1 %v431_v32  ;;  %v437_v34 = vsub.f32 %v2441_v55, %v3365_v29  ;;  %v2494_v58 = vand.u32 4294901760, %v14_v44  ;;  %v3425_v38 = vand.u32 4294901760, %v2462_v36 }
  0x27   :  { %3423 = vst [vmem:[#allocation23_spill] sm:$0xff] %v2457_v39  ;;  %1843 = vmatprep.subr.mxu0 %v2443_v48  ;;  %1876 = vmatpush3.msra.mxu1 %v319_v27  ;;  %v325_v46 = vsub.f32 %v2451_v54, %v3368_v42  ;;  %v444_v32 = vsub.f32 %v2454_v43, %v3371_v41  ;;  %v3426_v55 = vand.u32 4294901760, %v2465_v23  ;;  %v3427_v54 = vand.u32 4294901760, %v2468_v28 }
  0x28   :  { %v332_v29 = vsub.f32 %v2457_v39, %v3372_v52  ;;  %3424 = vst [vmem:[#allocation24_spill] sm:$0xff] %v2494_v58  ;;  %1844 = vmatpush3.msra.mxu0 %v2445_v37  ;;  %v438_v56 = vand.u32 4294901760, %v437_v34  ;;  %v451_v27 = vsub.f32 %v2462_v36, %v3425_v38  ;;  %v2508_v37 = vsub.f32 %v14_v44, %v2494_v58 }
  0x29   :  { %v339_v42 = vsub.f32 %v2465_v23, %v3426_v55  ;;  %v458_v41 = vsub.f32 %v2468_v28, %v3427_v54  ;;  %1845 = vmatprep.subr.mxu0 %v2447_v53  ;;  %v326_v52 = vand.u32 4294901760, %v325_v46  ;;  %v445_v39 = vand.u32 4294901760, %v444_v32 }
  0x2a   :  { %v333_v43 = vand.u32 4294901760, %v332_v29  ;;  %3428 = vst [vmem:[#allocation25_spill] sm:$0xff] %v2508_v37  ;;  %1846 = vmatpush3.msra.mxu0 %v2494_v58  ;;  %1877 = vmatprep.subr.mxu1 %v438_v56  ;;  %v452_v34 = vand.u32 4294901760, %v451_v27  ;;  %v3379_v38 = vand.u32 4294901760, %v2508_v37  ;;  %v64_v56 = vlaneseq }
  0x2b   :  { %1891 = vmatprep.subr.mxu0 %v2129_v14  ;;  %1878 = vmatpush3.msra.mxu1 %v326_v52  ;;  %v340_v55 = vand.u32 4294901760, %v339_v42  ;;  %v459_v54 = vand.u32 4294901760, %v458_v41  ;;  %v3385_v52 = vmov 1.0  }
  0x2c   :  { %1879 = vmatprep.subr.mxu1 %v445_v39  ;;  %v346_v29 = vsub.f32 %v2508_v37, %v3379_v38  ;;  %v2517_v46 = vand.u32 127, %v64_v56 }
  0x2d   :  { %1880 = vmatpush3.msra.mxu1 %v333_v43  ;;  %v3380_v43 = vmov 0.0  }
  0x2e   :  { %1881 = vmatprep.subr.mxu1 %v452_v34  ;;  %v347_v44 = vand.u32 4294901760, %v346_v29  ;;  %v2520_v42 = vadd.s32 128, %v2517_v46 }
  0x2f   :  { %1882 = vmatpush3.msra.mxu1 %v340_v55 }
  0x30   :  { %1883 = vmatprep.subr.mxu1 %v459_v54 }
  0x31   :  { %1884 = vmatpush3.msra.mxu1 %v347_v44 }
  0x32   :  { %1929 = vmatprep.subr.mxu1 %v2099_v3 }
  0x7d   :  { %v2522_v39 = vpop.permute.xlu0 %70 }
  0x7e   :  { %vm76_vm0 = vcmp.eq.s32.totalorder %v2522_v39, %v2520_v42  ;;  %vm75_vm1 = vcmp.eq.s32.totalorder %v2522_v39, %v2517_v46 }
  0x7f   :  { %v1784_v41 = vsel %vm76_vm0, 1.0, %v3380_v43  ;;  %1791 = vmatprep.mubr.msk.f32.mxu1 %vm76_vm0, %v3385_v52  ;;  %v1783_v32 = vsel %vm75_vm1, 1.0, %v3380_v43 }
  0x80   :  { %v207_v27 = vsub.f32 %v1784_v41, %v1784_v41  ;;  %v2540_v34 = vsub.f32 %v1783_v32, %v1783_v32  ;;  %1792 = vmatmul.mubr.msk.f32.vlgmr.msra.gmra.mxu1 %vm75_vm1, %v3385_v52 }
  0x81   :  { %1930 = vmatpush3.msra.mxu1 %v2110_v7  ;;  %v2547_v55 = vpop.permute.xlu0 %73 }
  0x82   :  { %3429 = vst [vmem:[#allocation26_spill] sm:$0xff] %v2547_v55  ;;  %1931 = vmatprep.subr.mxu1 %v2112_v8  ;;  %vm80_vm2 = vcmp.eq.s32.totalorder %v2547_v55, %v2520_v42  ;;  %vm79_vm3 = vcmp.eq.s32.totalorder %v2547_v55, %v2517_v46  ;;  %v208_v54 = vand.u32 4294901760, %v207_v27  ;;  %v3387_v56 = vand.u32 4294901760, %v2540_v34  ;;  %v3439_v55 = vld [vmem:[#allocation13_spill] sm:$0xff] }
  0x83   :  { %1932 = vmatpush3.msra.mxu1 %v2114_v9  ;;  %v1788_v29 = vsel %vm80_vm2, 1.0, %v3380_v43  ;;  %1793 = vmatprep.mubr.msk.f32.mxu1 %vm80_vm2, %v3385_v52  ;;  %v1787_v44 = vsel %vm79_vm3, 1.0, %v3380_v43 }
  0x84   :  { %v2568_v41 = vsub.f32 %v1788_v29, %v1788_v29  ;;  %1933 = vmatprep.subr.mxu1 %v2131_v15  ;;  %v2571_v32 = vsub.f32 %v1787_v44, %v1787_v44  ;;  %1794 = vmatmul.mubr.msk.f32.gmra.mxu1 %vm79_vm3, %v3385_v52  ;;  %v209_v38 = vsub.f32 %v207_v27, %v208_v54 }
  0x85   :  { %1934 = vmatpush3.msra.mxu1 %v2133_v16  ;;  %722 = vmatprep.mubr.f32.mxu1 %v208_v54  ;;  %v215_v43 = vsub.f32 %v2540_v34, %v3387_v56 }
  0x86   :  { %1935 = vmatprep.subr.mxu1 %v2135_v17  ;;  %v210_v29 = vand.u32 4294901760, %v209_v38  ;;  %v223_v14 = vand.u32 4294901760, %v2568_v41  ;;  %v3388_v44 = vand.u32 4294901760, %v2571_v32 }
  0x87   :  { %1936 = vmatpush3.msra.mxu1 %v2150_v22  ;;  %v216_v37 = vand.u32 4294901760, %v215_v43  ;;  %v3431_v43 = vld [vmem:[#allocation7_spill] sm:$0xff] }
  0x88   :  { %1937 = vmatprep.subr.mxu1 %v2224_v57  ;;  %211 = vmatprep.mubr.f32.mxu0 %v210_v29  ;;  %v224_v52 = vsub.f32 %v2568_v41, %v223_v14  ;;  %v230_v54 = vsub.f32 %v2571_v32, %v3388_v44  ;;  %v3435_v29 = vld [vmem:[#allocation10_spill] sm:$0xff]  ;;  %v3438_v44 = vld [vmem:[#allocation12_spill] sm:$0xff] }
  0x89   :  { %1938 = vmatpush3.msra.mxu1 %v2229_v60  ;;  %217 = vmatmul.mubr.f32.vlgmr.msra.gmra.mxu0 %v216_v37  ;;  %v3430_v37 = vld [vmem:[#allocation6_spill] sm:$0xff] }
  0x8a   :  { %1892 = vmatpush3.msra.mxu0 %v2142_v19  ;;  %1939 = vmatprep.subr.mxu1 %v2231_v61  ;;  %v225_v38 = vand.u32 4294901760, %v224_v52  ;;  %v231_v56 = vand.u32 4294901760, %v230_v54  ;;  %v3432_v52 = vld [vmem:[#allocation8_spill] sm:$0xff]  ;;  %v3436_v54 = vld [vmem:[#allocation11_spill] sm:$0xff] }
  0x8b   :  { %1893 = vmatprep.subr.mxu0 %v2145_v20  ;;  %1940 = vmatpush3.msra.mxu1 %v2233_v62 }
  0x8c   :  { %1894 = vmatpush3.msra.mxu0 %v2148_v21  ;;  %1941 = vmatprep.subr.mxu1 %v2238_v0 }
  0x8d   :  { %226 = vmatprep.mubr.f32.mxu0 %v225_v38  ;;  %1895 = vmatprep.subr.mxu0 %v2155_v24  ;;  %v3437_v38 = vld [vmem:[#allocation19_spill] sm:$0xff] }
  0x8e   :  { %1942 = vmatpush3.msra.mxu1 %v2240_v1  ;;  %232 = vmatmul.mubr.f32.gmra.mxu0 %v231_v56  ;;  %v3434_v56 = vld [vmem:[#allocation9_spill] sm:$0xff] }
  0x8f   :  { %1896 = vmatpush3.msra.mxu0 %v2158_v25  ;;  %1943 = vmatprep.subr.mxu1 %v2242_v2 }
  0x90   :  { %1897 = vmatprep.subr.mxu0 %v2161_v26  ;;  %606 = vmatprep.mubr.f32.mxu0 %v207_v27  ;;  %v3433_v27 = vld [vmem:[#allocation15_spill] sm:$0xff] }
  0x91   :  { %1944 = vmatpush3.msra.mxu1 %v2254_v10  ;;  %1898 = vmatpush3.msra.mxu0 %v2168_v30 }
  0x92   :  { %1945 = vmatprep.subr.mxu1 %v2328_v40  ;;  %1899 = vmatprep.subr.mxu0 %v2236_v63 }
  0x93   :  { %1946 = vmatpush3.msra.mxu1 %v2333_v35  ;;  %1900 = vmatpush3.msra.mxu0 %v2246_v4 }
  0x94   :  { %1947 = vmatprep.subr.mxu1 %v2335_v31  ;;  %1901 = vmatprep.subr.mxu0 %v2249_v5 }
  0x95   :  { %1948 = vmatpush3.msra.mxu1 %v2337_v11  ;;  %1902 = vmatpush3.msra.mxu0 %v2252_v6 }
  0x96   :  { %1949 = vmatprep.subr.mxu1 %v2342_v49  ;;  %1903 = vmatprep.subr.mxu0 %v2259_v12 }
  0x97   :  { %1950 = vmatpush3.msra.mxu1 %v2344_v50  ;;  %1904 = vmatpush3.msra.mxu0 %v2262_v13 }
  0x98   :  { %1951 = vmatprep.subr.mxu1 %v2346_v51  ;;  %1905 = vmatprep.subr.mxu0 %v2265_v18 }
  0x99   :  { %1952 = vmatpush3.msra.mxu1 %v2358_v47  ;;  %1906 = vmatpush3.msra.mxu0 %v3430_v37 }
  0x9a   :  { %1953 = vmatprep.subr.mxu1 %v2432_v45  ;;  %1907 = vmatprep.subr.mxu0 %v3431_v43 }
  0x9b   :  { %1954 = vmatpush3.msra.mxu1 %v2434_v33  ;;  %1908 = vmatpush3.msra.mxu0 %v3432_v52 }
  0x9c   :  { %1955 = vmatprep.subr.mxu1 %v3433_v27  ;;  %1909 = vmatprep.subr.mxu0 %v3434_v56  ;;  %v3440_v27 = vld [vmem:[#allocation14_spill] sm:$0xff] }
  0x9d   :  { %1956 = vmatpush3.msra.mxu1 %v2438_v59  ;;  %1910 = vmatpush3.msra.mxu0 %v3435_v29  ;;  %v3441_v59 = vand.u32 4294901760, %v2540_v34 }
  0x9e   :  { %1957 = vmatprep.subr.mxu1 %v2443_v48  ;;  %1911 = vmatprep.subr.mxu0 %v3436_v54  ;;  %v3442_v48 = vld [vmem:[#allocation17_spill] sm:$0xff] }
  0x9f   :  { %1958 = vmatpush3.msra.mxu1 %v3437_v38  ;;  %1912 = vmatpush3.msra.mxu0 %v3438_v44  ;;  %v3443_v38 = vld [vmem:[#allocation21_spill] sm:$0xff] }
  0xa0   :  { %1959 = vmatprep.subr.mxu1 %v2447_v53  ;;  %1913 = vmatprep.subr.mxu0 %v3439_v55  ;;  %v3444_v53 = vld [vmem:[#allocation22_spill] sm:$0xff] }
  0xa1   :  { %1960 = vmatpush3.msra.mxu1 %v2494_v58  ;;  %1914 = vmatpush3.msra.mxu0 %v3440_v27  ;;  %v3445_v58 = vld [vmem:[#allocation23_spill] sm:$0xff]  ;;  %v3446_v27 = vand.u32 4294901760, %v2571_v32 }
  0xa2   :  { %726 = vmatmul.mubr.f32.vlgmr.msra.gmra.mxu1 %v3441_v59  ;;  %2005 = vmatprep.subr.mxu1 %v2099_v3  ;;  %v3447_v3 = vmov 1.0  }
  0xa3   :  { %1915 = vmatprep.subr.mxu0 %v3442_v48  ;;  %733 = vmatprep.mubr.f32.mxu1 %v223_v14  ;;  %v3451_v14 = vand.u32 4294901760, %v2142_v19  ;;  %v3454_v19 = vand.u32 4294901760, %v2155_v24 }
  0xa4   :  { %2006 = vmatpush3.msra.mxu1 %v2110_v7  ;;  %1916 = vmatpush3.msra.mxu0 %v3443_v38  ;;  %v3448_v7 = vld [vmem:[#allocation25_spill] sm:$0xff] }
  0xa5   :  { %2007 = vmatprep.subr.mxu1 %v2112_v8  ;;  %1917 = vmatprep.subr.mxu0 %v3444_v53  ;;  %v3449_v8 = vld [vmem:[#allocation5_spill] sm:$0xff] }
  0xa6   :  { %2008 = vmatpush3.msra.mxu1 %v2114_v9  ;;  %1918 = vmatpush3.msra.mxu0 %v3445_v58  ;;  %v3450_v9 = vand.u32 4294901760, %v3449_v8  ;;  %v3473_v8 = vand.u32 4294901760, %v3436_v54  ;;  %v53_v54 = vld [vmem:[%s3319_s1 + $0x138] sm:$0xff] }
  0xa7   :  { %737 = vmatmul.mubr.f32.gmra.mxu1 %v3446_v27  ;;  %2009 = vmatprep.subr.mxu1 %v2131_v15  ;;  %v3452_v15 = vand.u32 4294901760, %v2145_v20  ;;  %v3455_v20 = vand.u32 4294901760, %v2158_v25  ;;  %v3457_v25 = vand.u32 4294901760, %v2168_v30  ;;  %v3460_v30 = vand.u32 4294901760, %v2249_v5  ;;  %v57_v5 = vld [vmem:[%s3319_s1 + $0x158] sm:$0xff]  ;;  %v54_v27 = vld [vmem:[%s3319_s1 + $0x140] sm:$0xff] }
  0xa8   :  { %1919 = vmatprep.subr.mxu0 %v2462_v36  ;;  %2010 = vmatpush3.msra.mxu1 %v2133_v16  ;;  %v3453_v16 = vand.u32 4294901760, %v2148_v21  ;;  %v60_v21 = vld [vmem:[%s3319_s1 + $0x170] sm:$0xff] }
  0xa9   :  { %1799 = vmatprep.mubr.msk.f32.mxu1 %vm76_vm0, %v3447_v3  ;;  %1920 = vmatpush3.msra.mxu0 %v2465_v23 }
  0xaa   :  { %2011 = vmatprep.subr.mxu1 %v2135_v17  ;;  %1921 = vmatprep.subr.mxu0 %v2468_v28  ;;  %v61_v17 = vld [vmem:[%s3319_s1 + $0x178] sm:$0xff] }
  0xab   :  { %2012 = vmatpush3.msra.mxu1 %v2150_v22  ;;  %1922 = vmatpush3.msra.mxu0 %v3448_v7  ;;  %v3456_v22 = vand.u32 4294901760, %v2161_v26  ;;  %v2694_v24 = vand.u32 4294901760, %v61_v17  ;;  %v3459_v26 = vand.u32 4294901760, %v2246_v4 }
  0xac   :  { %2013 = vmatprep.subr.mxu1 %v2224_v57  ;;  %609 = vmatmul.mubr.f32.vlgmr.msra.gmra.mxu0 %v2540_v34  ;;  %v59_v57 = vld [vmem:[%s3319_s1 + $0x168] sm:$0xff]  ;;  %v3468_v34 = vld [vmem:[#allocation15_spill] sm:$0xff] }
  0xad   :  { %1967 = vmatprep.subr.mxu0 %v3450_v9  ;;  %2014 = vmatpush3.msra.mxu1 %v2229_v60  ;;  %v3458_v60 = vand.u32 4294901760, %v2236_v63  ;;  %v58_v63 = vld [vmem:[%s3319_s1 + $0x160] sm:$0xff] }
  0xae   :  { %615 = vmatprep.mubr.f32.mxu0 %v2568_v41  ;;  %1968 = vmatpush3.msra.mxu0 %v3451_v14 }
  0xaf   :  { %2015 = vmatprep.subr.mxu1 %v2231_v61  ;;  %1969 = vmatprep.subr.mxu0 %v3452_v15  ;;  %v2705_v61 = vand.u32 4294901760, %v60_v21  ;;  %v3475_v15 = vand.u32 4294901760, %v3438_v44 }
  0xb0   :  { %2016 = vmatpush3.msra.mxu1 %v2233_v62  ;;  %1970 = vmatpush3.msra.mxu0 %v3453_v16  ;;  %v2714_v62 = vsub.f32 %v61_v17, %v2694_v24  ;;  %v3476_v16 = vmov 0.0  }
  0xb1   :  { %2017 = vmatprep.subr.mxu1 %v2238_v0  ;;  %618 = vmatmul.mubr.f32.gmra.mxu0 %v2571_v32  ;;  %v2716_v0 = vand.u32 4294901760, %v59_v57  ;;  %v2728_v4 = vsub.f32 %v60_v21, %v2705_v61  ;;  %v3478_v21 = vand.u32 4294901760, %v3439_v55  ;;  %v52_v55 = vld [vmem:[%s3319_s1 + $0x130] sm:$0xff] }
  0xb2   :  { %1971 = vmatprep.subr.mxu0 %v3454_v19  ;;  %2018 = vmatpush3.msra.mxu1 %v2240_v1  ;;  %v3461_v1 = vand.u32 4294901760, %v2252_v6  ;;  %v2739_v6 = vadd.s32 384, %v2517_v46 }
  0xb3   :  { %1972 = vmatpush3.msra.mxu0 %v3455_v20  ;;  %1795 = vmatprep.mubr.msk.f32.mxu0 %vm76_vm0, %v3447_v3  ;;  %v3477_v20 = vld [vmem:[#allocation20_spill] sm:$0xff] }
  0xb4   :  { %2019 = vmatprep.subr.mxu1 %v2242_v2  ;;  %1973 = vmatprep.subr.mxu0 %v3456_v22  ;;  %v3462_v2 = vand.u32 4294901760, %v2259_v12  ;;  %v3464_v12 = vand.u32 4294901760, %v2265_v18  ;;  %v3466_v18 = vand.u32 4294901760, %v3431_v43  ;;  %vm78_vm4 = vcmp.eq.s32.totalorder %v2522_v39, %v2739_v6 }
  0xb5   :  { %2020 = vmatpush3.msra.mxu1 %v2254_v10  ;;  %1974 = vmatpush3.msra.mxu0 %v3457_v25  ;;  %v3463_v10 = vand.u32 4294901760, %v2262_v13  ;;  %v3465_v13 = vand.u32 4294901760, %v3430_v37  ;;  %v3470_v37 = vld [vmem:[#allocation16_spill] sm:$0xff]  ;;  %v3471_v43 = vand.u32 4294901760, %v3435_v29  ;;  %v3474_v29 = vld [vmem:[#allocation19_spill] sm:$0xff]  ;;  %v2801_v17 = vsel %vm78_vm4, 1.0, %v3476_v16 }
  0xb6   :  { %2021 = vmatprep.subr.mxu1 %v2328_v40  ;;  %1975 = vmatprep.subr.mxu0 %v3458_v60  ;;  %v2751_v40 = vand.u32 4294901760, %v57_v5  ;;  %v3479_v60 = vld [vmem:[#allocation24_spill] sm:$0xff] }
  0xb7   :  { %2022 = vmatpush3.msra.mxu1 %v2333_v35  ;;  %1976 = vmatpush3.msra.mxu0 %v3459_v26  ;;  %v2746_v35 = vsub.f32 %v59_v57, %v2716_v0  ;;  %v2816_v57 = vand.u32 4294901760, %v54_v27  ;;  %v3480_v26 = vld [vmem:[#allocation14_spill] sm:$0xff] }
  0xb8   :  { %2023 = vmatprep.subr.mxu1 %v2335_v31  ;;  %1977 = vmatprep.subr.mxu0 %v3460_v30  ;;  %v1144_v31 = vand.u32 4294901760, %v2714_v62  ;;  %v3481_v30 = vand.u32 4294901760, %v3480_v26 }
  0xb9   :  { %2024 = vmatpush3.msra.mxu1 %v2337_v11  ;;  %1978 = vmatpush3.msra.mxu0 %v3461_v1  ;;  %v2736_v11 = vand.u32 4294901760, %v58_v63 }
  0xba   :  { %2025 = vmatprep.subr.mxu1 %v2342_v49  ;;  %1979 = vmatprep.subr.mxu0 %v3462_v2  ;;  %v56_v49 = vld [vmem:[%s3319_s1 + $0x150] sm:$0xff]  ;;  %v1145_v41 = vsub.f32 %v2714_v62, %v1144_v31  ;;  %v101_v2 = vsel %vm99_vm5, %v2801_v17, 0 }
  0xbb   :  { %2026 = vmatpush3.msra.mxu1 %v2344_v50  ;;  %1980 = vmatpush3.msra.mxu0 %v3463_v10  ;;  %v1151_v50 = vand.u32 4294901760, %v2728_v4  ;;  %v2764_v59 = vsub.f32 %v58_v63, %v2736_v11  ;;  %v2778_v32 = vand.u32 4294901760, %v56_v49  ;;  %v2835_v10 = vand.u32 4294901760, %v53_v54 }
  0xbc   :  { %2027 = vmatprep.subr.mxu1 %v2346_v51  ;;  %1981 = vmatprep.subr.mxu0 %v3464_v12  ;;  %v3467_v51 = vand.u32 4294901760, %v3432_v52  ;;  %v2784_v52 = vsub.f32 %v57_v5, %v2751_v40  ;;  %v1146_v22 = vand.u32 4294901760, %v1145_v41  ;;  %v3482_v12 = vand.u32 4294901760, %v3442_v48 }
  0xbd   :  { %2028 = vmatpush3.msra.mxu1 %v2358_v47  ;;  %1982 = vmatpush3.msra.mxu0 %v3465_v13  ;;  %v55_v47 = vld [vmem:[%s3319_s1 + $0x148] sm:$0xff]  ;;  %v1152_v9 = vsub.f32 %v2728_v4, %v1151_v50  ;;  %v1165_v19 = vand.u32 4294901760, %v2764_v59  ;;  %v2814_v25 = vsub.f32 %v56_v49, %v2778_v32  ;;  %v3483_v13 = vld [vmem:[#allocation26_spill] sm:$0xff]  ;;  %v2852_v48 = vand.u32 4294901760, %v52_v55 }
  0xbe   :  { %2029 = vmatprep.subr.mxu1 %v2432_v45  ;;  %1983 = vmatprep.subr.mxu0 %v3466_v18  ;;  %v3469_v45 = vand.u32 4294901760, %v3434_v56  ;;  %v3472_v56 = vld [vmem:[#allocation18_spill] sm:$0xff]  ;;  %v2795_v14 = vand.u32 4294901760, %v55_v47  ;;  %v1172_v63 = vand.u32 4294901760, %v2784_v52  ;;  %v3484_v18 = vand.u32 4294901760, %v3443_v38 }
  0xbf   :  { %2030 = vmatpush3.msra.mxu1 %v2434_v33  ;;  %1984 = vmatpush3.msra.mxu0 %v3467_v51  ;;  %v1158_v33 = vand.u32 4294901760, %v2746_v35  ;;  %v1153_v1 = vand.u32 4294901760, %v1152_v9  ;;  %v1166_v49 = vsub.f32 %v2764_v59, %v1165_v19  ;;  %v3485_v41 = vand.u32 4294901760, %v3444_v53  ;;  %v50_v53 = vld [vmem:[%s3319_s1 + $0x120] sm:$0xff] }
  0xc0   :  { %2031 = vmatprep.subr.mxu1 %v3468_v34  ;;  %1985 = vmatprep.subr.mxu0 %v3469_v45  ;;  %v2833_v5 = vsub.f32 %v55_v47, %v2795_v14  ;;  %v1179_v47 = vand.u32 4294901760, %v2814_v25  ;;  %v2850_v34 = vsub.f32 %v54_v27, %v2816_v57  ;;  %v51_v45 = vld [vmem:[%s3319_s1 + $0x128] sm:$0xff]  ;;  %v1173_v38 = vsub.f32 %v2784_v52, %v1172_v63 }
  0xc1   :  { %2032 = vmatpush3.msra.mxu1 %v3470_v37  ;;  %1986 = vmatpush3.msra.mxu0 %v3471_v43  ;;  %v1159_v44 = vsub.f32 %v2746_v35, %v1158_v33  ;;  %v2860_v37 = vsub.f32 %v101_v2, %v101_v2  ;;  %v3486_v43 = vand.u32 4294901760, %v3445_v58  ;;  %v2879_v9 = vand.u32 4294901760, %v51_v45 }
  0xc2   :  { %2033 = vmatprep.subr.mxu1 %v3472_v56  ;;  %1987 = vmatprep.subr.mxu0 %v3473_v8  ;;  %v1186_v27 = vand.u32 4294901760, %v2833_v5  ;;  %v2869_v56 = vsub.f32 %v53_v54, %v2835_v10  ;;  %v1167_v8 = vand.u32 4294901760, %v1166_v49  ;;  %v3487_v58 = vand.u32 4294901760, %v2462_v36  ;;  %v47_v49 = vld [vmem:[%s3319_s1 + $0x108] sm:$0xff] }
  0xc3   :  { %2034 = vmatpush3.msra.mxu1 %v3474_v29  ;;  %1988 = vmatpush3.msra.mxu0 %v3475_v15  ;;  %v1160_v51 = vand.u32 4294901760, %v1159_v44  ;;  %v1180_v29 = vsub.f32 %v2814_v25, %v1179_v47  ;;  %v1193_v15 = vand.u32 4294901760, %v2850_v34  ;;  %v2888_v54 = vsub.f32 %v52_v55, %v2852_v48 }
  0xc4   :  { %2035 = vmatprep.subr.mxu1 %v3477_v20  ;;  %1989 = vmatprep.subr.mxu0 %v3478_v21  ;;  %v49_v20 = vld [vmem:[%s3319_s1 + $0x118] sm:$0xff]  ;;  %v3488_v36 = vand.u32 4294901760, %v2465_v23  ;;  %v1174_v21 = vand.u32 4294901760, %v1173_v38  ;;  %v2898_v44 = vand.u32 4294901760, %v50_v53  ;;  %v1187_v26 = vsub.f32 %v2833_v5, %v1186_v27  ;;  %v48_v23 = vld [vmem:[%s3319_s1 + $0x110] sm:$0xff] }
  0xc5   :  { %2036 = vmatpush3.msra.mxu1 %v3479_v60  ;;  %1990 = vmatpush3.msra.mxu0 %v3481_v30  ;;  %v3489_v60 = vand.u32 4294901760, %v2468_v28  ;;  %v3398_v30 = vand.u32 4294901760, %v2869_v56  ;;  %v3490_v55 = vand.u32 4294901760, %v3448_v7  ;;  %v2915_v2 = vand.u32 4294901760, %v49_v20 }
  0xc6   :  { %1800 = vmatmul.mubr.msk.f32.vlgmr.msra.gmra.mxu1 %vm75_vm1, %v3447_v3  ;;  %1141 = vmatprep.subr.mxu1 %v3476_v16  ;;  %v1181_v28 = vand.u32 4294901760, %v1180_v29  ;;  %v3395_v7 = vand.u32 4294901760, %v2888_v54  ;;  %v1188_v38 = vand.u32 4294901760, %v1187_v26  ;;  %vm82_vm7 = vcmp.eq.s32.totalorder %v3483_v13, %v2739_v6 }
  0xc7   :  { %1991 = vmatprep.subr.mxu0 %v3482_v12  ;;  %1801 = vmatprep.mubr.msk.f32.mxu1 %vm80_vm2, %v3447_v3  ;;  %v1194_v12 = vsub.f32 %v2850_v34, %v1193_v15  ;;  %v2956_v42 = vsub.f32 %v49_v20, %v2915_v2 }
  0xc8   :  { %1147 = vmatpush1.msra.mxu1 %v1146_v22  ;;  %1992 = vmatpush3.msra.mxu0 %v3484_v18  ;;  %v1112_v22 = vand.u32 4294901760, %v2860_v37 }
  0xc9   :  { %1148 = vmatprep.subr.mxu1 %v3476_v16  ;;  %1993 = vmatprep.subr.mxu0 %v3485_v41  ;;  %v63_v41 = vld [vmem:[%s3319_s1 + $0x188] sm:$0x3f]  ;;  %v1195_v29 = vand.u32 4294901760, %v1194_v12  ;;  %v62_v12 = vld [vmem:[%s3319_s1 + $0x180] sm:$0xff] }
  0xca   :  { %1154 = vmatpush1.msra.mxu1 %v1153_v1  ;;  %1994 = vmatpush3.msra.mxu0 %v3486_v43  ;;  %v2913_v1 = vsub.f32 %v51_v45, %v2879_v9  ;;  %v1113_v18 = vsub.f32 %v2860_v37, %v1112_v22  ;;  %v2936_v45 = vand.u32 4294901760, %v48_v23  ;;  %v1201_v43 = vsub.f32 %v2869_v56, %v3398_v30 }
  0xcb   :  { %1802 = vmatmul.mubr.msk.f32.gmra.mxu1 %vm79_vm3, %v3447_v3  ;;  %1155 = vmatprep.subr.mxu1 %v3476_v16 }
  0xcc   :  { %1995 = vmatprep.subr.mxu0 %v3487_v58  ;;  %1161 = vmatpush1.msra.mxu1 %v1160_v51  ;;  %v2934_v51 = vsub.f32 %v50_v53, %v2898_v44  ;;  %v46_v53 = vld [vmem:[%s3319_s1 + $0x100] sm:$0xff]  ;;  %v2958_v58 = vand.u32 4294901760, %v47_v49  ;;  %v1114_v20 = vand.u32 4294901760, %v1113_v18  ;;  %v2971_v26 = vsub.f32 %v48_v23, %v2936_v45  ;;  %s2075_s1 = smov [#allocation2]  }
  0xcd   :  { %1803 = vmatprep.mubr.msk.f32.mxu1 %vm99_vm5, %v2801_v17  ;;  %1996 = vmatpush3.msra.mxu0 %v3488_v36  ;;  %v1208_v36 = vsub.f32 %v2888_v54, %v3395_v7  ;;  %v3399_v23 = vand.u32 4294901760, %v2956_v42  ;;  %s1772_s26 = sshll.u32 %s2075_s1, 4  ;;  %s1773_s26 = int_to_ptr.vmem [resolvable:$true] %s1772_s26 }
  0xce   :  { %1162 = vmatprep.subr.mxu1 %v3476_v16  ;;  %1997 = vmatprep.subr.mxu0 %v3489_v60  ;;  %v3397_v60 = vand.u32 4294901760, %v2934_v51  ;;  %s2050_s27 = scalar_lea.vmem %s1773_s26, 256  ;;  %p2055_p1 = scmp.lt.s32.totalorder %s1773_s26, %s1773_s26 }
  0xcf   :  { %1168 = vmatpush1.msra.mxu1 %v1167_v8  ;;  %1998 = vmatpush3.msra.mxu0 %v3490_v55  ;;  %v3396_v8 = vand.u32 4294901760, %v2913_v1  ;;  %v2973_v55 = vand.u32 4294901760, %v46_v53  ;;  %p2051_p0 = scmp.ne.s32.totalorder %s1773_s26, %s2050_s27  ;;  %p2056_p2 = scmp.lt.s32.totalorder %s2050_s27, %s2050_s27 }
  0xd0   :  { %1169 = vmatprep.subr.mxu1 %v3476_v16  ;;  %1796 = vmatmul.mubr.msk.f32.vlgmr.msra.gmra.mxu0 %vm75_vm1, %v3447_v3 }
  0xd1   :  { %1028 = vmatprep.subr.mxu0 %v3476_v16  ;;  %1175 = vmatpush1.msra.mxu1 %v1174_v21  ;;  %v108_v21 = vsel %vm106_vm6, %v63_v41, 0  ;;  %v1215_v18 = vsub.f32 %v2913_v1, %v3396_v8  ;;  %v2985_v41 = vsub.f32 %v47_v49, %v2958_v58  ;;  %v2997_v8 = vsub.f32 %v46_v53, %v2973_v55  ;;  %p2057_p3 = por %p2056_p2, %p2055_p1 }
  0xd2   :  { %1797 = vmatprep.mubr.msk.f32.mxu0 %vm80_vm2, %v3447_v3  ;;  %1030 = vmatpush1.msra.mxu0 %v2694_v24  ;;  %v2987_v7 = vand.u32 4294901760, %v108_v21  ;;  %v2999_v49 = vand.u32 4294901760, %v62_v12 }
  0xd3   :  { %1176 = vmatprep.subr.mxu1 %v3476_v16  ;;  %1031 = vmatprep.subr.mxu0 %v3476_v16  ;;  %p2058_p4 = pnand %p2057_p3, %p2051_p0 }
  0xd4   :  { %1182 = vmatpush1.msra.mxu1 %v1181_v28  ;;  %1033 = vmatpush1.msra.mxu0 %v2705_v61  ;;  %v1202_v28 = vand.u32 4294901760, %v1201_v43  ;;  %v1222_v43 = vsub.f32 %v2934_v51, %v3397_v60  ;;  %v3404_v60 = vand.u32 4294901760, %v2985_v41  ;;  %v3009_v30 = vsub.f32 %v108_v21, %v2987_v7 }
  0xd5   :  { %1183 = vmatprep.subr.mxu1 %v3476_v16  ;;  %1798 = vmatmul.mubr.msk.f32.gmra.mxu0 %vm79_vm3, %v3447_v3 }
  0xd6   :  { %1034 = vmatprep.subr.mxu0 %v3476_v16  ;;  %1189 = vmatpush1.msra.mxu1 %v1188_v38  ;;  %v1209_v38 = vand.u32 4294901760, %v1208_v36  ;;  %v1229_v36 = vsub.f32 %v2956_v42, %v3399_v23  ;;  %v1223_v53 = vand.u32 4294901760, %v1222_v43  ;;  %v3019_v23 = vsub.f32 %v62_v12, %v2999_v49 }
  0xd7   :  { %1036 = vmatpush1.msra.mxu0 %v2716_v0  ;;  %1115 = vmatprep.mubr.f32.mxu0 %v1114_v20  ;;  %v3400_v20 = vand.u32 4294901760, %v2971_v26  ;;  %v3402_v43 = vand.u32 4294901760, %v3009_v30 }
  0xd8   :  { %1190 = vmatprep.subr.mxu1 %v3476_v16  ;;  %1037 = vmatprep.subr.mxu0 %v3476_v16  ;;  %v1230_v21 = vand.u32 4294901760, %v1229_v36  ;;  %v3401_v36 = vand.u32 4294901760, %v3019_v23 }
  0xd9   :  { %1196 = vmatpush1.msra.mxu1 %v1195_v29  ;;  %1039 = vmatpush1.msra.mxu0 %v2736_v11  ;;  %v1216_v29 = vand.u32 4294901760, %v1215_v18  ;;  %v3403_v18 = vand.u32 4294901760, %v2997_v8 }
  0xda   :  { %1197 = vmatprep.subr.mxu1 %v3476_v16  ;;  %1040 = vmatprep.subr.mxu0 %v3476_v16  ;;  %v1292_v6 = vsub.f32 %v3019_v23, %v3401_v36 }
  0xdb   :  { %1203 = vmatpush1.msra.mxu1 %v1202_v28  ;;  %1042 = vmatpush1.msra.mxu0 %v2751_v40  ;;  %v1236_v28 = vsub.f32 %v2971_v26, %v3400_v20  ;;  %v3029_v20 = vadd.s32 256, %v2517_v46 }
  0xdc   :  { %1204 = vmatprep.subr.mxu1 %v3476_v16  ;;  %1043 = vmatprep.subr.mxu0 %v3476_v16 }
  0xdd   :  { %1210 = vmatpush1.msra.mxu1 %v1209_v38  ;;  %1045 = vmatpush1.msra.mxu0 %v2778_v32  ;;  %v1243_v38 = vsub.f32 %v2985_v41, %v3404_v60  ;;  %v1237_v12 = vand.u32 4294901760, %v1236_v28  ;;  %vm77_vm8 = vcmp.eq.s32.totalorder %v2522_v39, %v3029_v20  ;;  %vm81_vm9 = vcmp.eq.s32.totalorder %v3483_v13, %v3029_v20 }
  0xde   :  { %1211 = vmatprep.subr.mxu1 %v3476_v16  ;;  %1046 = vmatprep.subr.mxu0 %v3476_v16 }
  0xdf   :  { %1217 = vmatpush1.msra.mxu1 %v1216_v29  ;;  %1048 = vmatpush1.msra.mxu0 %v2795_v14  ;;  %v1250_v29 = vsub.f32 %v2997_v8, %v3403_v18  ;;  %v1244_v46 = vand.u32 4294901760, %v1243_v38  ;;  %v1785_v38 = vsel %vm77_vm8, 1.0, %v3476_v16 }
  0xe0   :  { %1218 = vmatprep.subr.mxu1 %v3476_v16  ;;  %1049 = vmatprep.subr.mxu0 %v3476_v16 }
  0xe1   :  { %1224 = vmatpush1.msra.mxu1 %v1223_v53  ;;  %1051 = vmatpush1.msra.mxu0 %v2816_v57  ;;  %v1285_v53 = vsub.f32 %v3009_v30, %v3402_v43  ;;  %v1251_v28 = vand.u32 4294901760, %v1250_v29  ;;  %v1293_v29 = vand.u32 4294901760, %v1292_v6  ;;  %v3071_v43 = vsub.f32 %v1785_v38, %v1785_v38 }
  0xe2   :  { %1225 = vmatprep.subr.mxu1 %v3476_v16  ;;  %1052 = vmatprep.subr.mxu0 %v3476_v16 }
  0xe3   :  { %1231 = vmatpush1.msra.mxu1 %v1230_v21  ;;  %1054 = vmatpush1.msra.mxu0 %v2835_v10  ;;  %v3057_v21 = vsel %vm82_vm7, 1.0, %v3476_v16 }
  0xe4   :  { %1232 = vmatprep.subr.mxu1 %v3476_v16  ;;  %1055 = vmatprep.subr.mxu0 %v3476_v16  ;;  %v104_v36 = vsel %vm99_vm5, %v3057_v21, 0 }
  0xe5   :  { %1238 = vmatpush1.msra.mxu1 %v1237_v12  ;;  %1057 = vmatpush1.msra.mxu0 %v2852_v48  ;;  %v1286_v12 = vand.u32 4294901760, %v1285_v53  ;;  %v1789_v53 = vsel %vm81_vm9, 1.0, %v3476_v16 }
  0xe6   :  { %1239 = vmatprep.subr.mxu1 %v3476_v16  ;;  %1058 = vmatprep.subr.mxu0 %v3476_v16 }
  0xe7   :  { %1245 = vmatpush1.msra.mxu1 %v1244_v46  ;;  %1060 = vmatpush1.msra.mxu0 %v2879_v9  ;;  %v3078_v46 = vsub.f32 %v104_v36, %v104_v36  ;;  %v3094_v36 = vsub.f32 %v1789_v53, %v1789_v53 }
  0xe8   :  { %1246 = vmatprep.subr.mxu1 %v3476_v16  ;;  %1061 = vmatprep.subr.mxu0 %v3476_v16 }
  0xe9   :  { %1252 = vmatpush1.msra.mxu1 %v1251_v28  ;;  %1063 = vmatpush1.msra.mxu0 %v2898_v44  ;;  %v1118_v28 = vand.u32 4294901760, %v3071_v43  ;;  %v1127_v6 = vand.u32 4294901760, %v3078_v46 }
  0xea   :  { %1281 = vmatprep.subr.mxu1 %v3476_v16  ;;  %1064 = vmatprep.subr.mxu0 %v3476_v16 }
  0xeb   :  { %1287 = vmatpush2.msra.mxu1 %v1286_v12  ;;  %1066 = vmatpush1.msra.mxu0 %v2915_v2  ;;  %v1119_v38 = vsub.f32 %v3071_v43, %v1118_v28  ;;  %v1133_v12 = vand.u32 4294901760, %v3094_v36 }
  0xec   :  { %1288 = vmatprep.subr.mxu1 %v3476_v16  ;;  %1067 = vmatprep.subr.mxu0 %v3476_v16 }
  0xed   :  { %1294 = vmatpush2.msra.mxu1 %v1293_v29  ;;  %1069 = vmatpush1.msra.mxu0 %v2936_v45  ;;  %v1128_v29 = vsub.f32 %v3078_v46, %v1127_v6  ;;  %v1120_v53 = vand.u32 4294901760, %v1119_v38  ;;  %v1134_v18 = vsub.f32 %v3094_v36, %v1133_v12 }
  0xee   :  { %1804 = vmatmul.mubr.msk.f32.vlgmr.msra.gmra.mxu1 %vm77_vm8, %v3447_v3  ;;  %1429 = vmatprep.subr.mxu1 %v3476_v16 }
  0xef   :  { %1070 = vmatprep.subr.mxu0 %v3476_v16  ;;  %1805 = vmatprep.mubr.msk.f32.mxu1 %vm99_vm5, %v3057_v21  ;;  %v1129_v60 = vand.u32 4294901760, %v1128_v29 }
  0xf0   :  { %1431 = vmatpush1.msra.mxu1 %v2694_v24  ;;  %1072 = vmatpush1.msra.mxu0 %v2958_v58 }
  0xf1   :  { %1432 = vmatprep.subr.mxu1 %v3476_v16  ;;  %1073 = vmatprep.subr.mxu0 %v3476_v16 }
  0xf2   :  { %1434 = vmatpush1.msra.mxu1 %v2705_v61  ;;  %1075 = vmatpush1.msra.mxu0 %v2973_v55 }
  0xf3   :  { %1806 = vmatmul.mubr.msk.f32.gmra.mxu1 %vm81_vm9, %v3447_v3  ;;  %1435 = vmatprep.subr.mxu1 %v3476_v16 }
  0xf4   :  { %1104 = vmatprep.subr.mxu0 %v3476_v16  ;;  %1437 = vmatpush1.msra.mxu1 %v2716_v0 }
  0xf5   :  { %1514 = vmatprep.mubr.f32.mxu1 %v1112_v22  ;;  %1106 = vmatpush2.msra.mxu0 %v2987_v7  ;;  %v1135_v22 = vand.u32 4294901760, %v1134_v18 }
  0xf6   :  { %1438 = vmatprep.subr.mxu1 %v3476_v16  ;;  %1107 = vmatprep.subr.mxu0 %v3476_v16 }
  0xf7   :  { %1440 = vmatpush1.msra.mxu1 %v2736_v11  ;;  %1109 = vmatpush2.msra.mxu0 %v2999_v49 }
  0xf8   :  { %1441 = vmatprep.subr.mxu1 %v3476_v16  ;;  %1121 = vmatmul.mubr.f32.vlgmr.msra.gmra.mxu0 %v1120_v53 }
  0xf9   :  { %1310 = vmatprep.subr.mxu0 %v3476_v16  ;;  %1443 = vmatpush1.msra.mxu1 %v2751_v40 }
  0xfa   :  { %1130 = vmatprep.mubr.f32.mxu0 %v1129_v60  ;;  %1313 = vmatpush1.msra.mxu0 %v2714_v62  ;;  %v3493_v62 = vand.u32 4294901760, %v2913_v1 }
  0xfb   :  { %1444 = vmatprep.subr.mxu1 %v3476_v16  ;;  %1314 = vmatprep.subr.mxu0 %v3476_v16 }
  0xfc   :  { %1446 = vmatpush1.msra.mxu1 %v2778_v32  ;;  %1317 = vmatpush1.msra.mxu0 %v2728_v4  ;;  %v3495_v4 = vand.u32 4294901760, %v2956_v42 }
  0xfd   :  { %1447 = vmatprep.subr.mxu1 %v3476_v16  ;;  %1136 = vmatmul.mubr.f32.gmra.mxu0 %v1135_v22 }
  0xfe   :  { %1318 = vmatprep.subr.mxu0 %v3476_v16  ;;  %1449 = vmatpush1.msra.mxu1 %v2795_v14 }
  0xff   :  { %1321 = vmatpush1.msra.mxu0 %v2746_v35  ;;  %1412 = vmatprep.mubr.f32.mxu0 %v2860_v37 }
 0x100   :  { %1450 = vmatprep.subr.mxu1 %v3476_v16  ;;  %1322 = vmatprep.subr.mxu0 %v3476_v16 }
 0x101   :  { %1452 = vmatpush1.msra.mxu1 %v2816_v57  ;;  %1325 = vmatpush1.msra.mxu0 %v2764_v59  ;;  %v3499_v59 = vand.u32 4294901760, %v3009_v30 }
 0x102   :  { %1453 = vmatprep.subr.mxu1 %v3476_v16  ;;  %1326 = vmatprep.subr.mxu0 %v3476_v16 }
 0x103   :  { %1455 = vmatpush1.msra.mxu1 %v2835_v10  ;;  %1329 = vmatpush1.msra.mxu0 %v2784_v52  ;;  %v3500_v52 = vand.u32 4294901760, %v3019_v23 }
 0x104   :  { %1456 = vmatprep.subr.mxu1 %v3476_v16  ;;  %1330 = vmatprep.subr.mxu0 %v3476_v16 }
 0x105   :  { %1458 = vmatpush1.msra.mxu1 %v2852_v48  ;;  %1333 = vmatpush1.msra.mxu0 %v2814_v25 }
 0x106   :  { %1459 = vmatprep.subr.mxu1 %v3476_v16  ;;  %1334 = vmatprep.subr.mxu0 %v3476_v16 }
 0x107   :  { %1461 = vmatpush1.msra.mxu1 %v2879_v9  ;;  %1337 = vmatpush1.msra.mxu0 %v2833_v5 }
 0x108   :  { %1462 = vmatprep.subr.mxu1 %v3476_v16  ;;  %1338 = vmatprep.subr.mxu0 %v3476_v16 }
 0x109   :  { %1464 = vmatpush1.msra.mxu1 %v2898_v44  ;;  %1341 = vmatpush1.msra.mxu0 %v2850_v34 }
 0x10a   :  { %1465 = vmatprep.subr.mxu1 %v3476_v16  ;;  %1342 = vmatprep.subr.mxu0 %v3476_v16 }
 0x10b   :  { %1467 = vmatpush1.msra.mxu1 %v2915_v2  ;;  %1345 = vmatpush1.msra.mxu0 %v2869_v56 }
 0x10c   :  { %1468 = vmatprep.subr.mxu1 %v3476_v16  ;;  %1346 = vmatprep.subr.mxu0 %v3476_v16 }
 0x10d   :  { %1470 = vmatpush1.msra.mxu1 %v2936_v45  ;;  %1349 = vmatpush1.msra.mxu0 %v2888_v54 }
 0x10e   :  { %1471 = vmatprep.subr.mxu1 %v3476_v16  ;;  %1350 = vmatprep.subr.mxu0 %v3476_v16 }
 0x10f   :  { %1473 = vmatpush1.msra.mxu1 %v2958_v58  ;;  %1353 = vmatpush1.msra.mxu0 %v2913_v1 }
 0x110   :  { %1474 = vmatprep.subr.mxu1 %v3476_v16  ;;  %1354 = vmatprep.subr.mxu0 %v3476_v16 }
 0x111   :  { %1476 = vmatpush1.msra.mxu1 %v2973_v55  ;;  %1357 = vmatpush1.msra.mxu0 %v2934_v51 }
 0x112   :  { %1505 = vmatprep.subr.mxu1 %v3476_v16  ;;  %1358 = vmatprep.subr.mxu0 %v3476_v16 }
 0x113   :  { %1507 = vmatpush2.msra.mxu1 %v2987_v7  ;;  %1361 = vmatpush1.msra.mxu0 %v2956_v42 }
 0x114   :  { %1508 = vmatprep.subr.mxu1 %v3476_v16  ;;  %1362 = vmatprep.subr.mxu0 %v3476_v16 }
 0x115   :  { %1510 = vmatpush2.msra.mxu1 %v2999_v49  ;;  %1365 = vmatpush1.msra.mxu0 %v2971_v26 }
 0x116   :  { %1518 = vmatmul.mubr.f32.vlgmr.msra.gmra.mxu1 %v1118_v28  ;;  %1667 = vmatprep.subr.mxu1 %v3476_v16 }
 0x117   :  { %1366 = vmatprep.subr.mxu0 %v3476_v16  ;;  %1525 = vmatprep.mubr.f32.mxu1 %v1127_v6 }
 0x118   :  { %1669 = vmatpush1.msra.mxu1 %v2694_v24  ;;  %1369 = vmatpush1.msra.mxu0 %v2985_v41  ;;  %v3491_v24 = vand.u32 4294901760, %v2869_v56 }
 0x119   :  { %1670 = vmatprep.subr.mxu1 %v3476_v16  ;;  %1370 = vmatprep.subr.mxu0 %v3476_v16 }
 0x11a   :  { %1672 = vmatpush1.msra.mxu1 %v2705_v61  ;;  %1373 = vmatpush1.msra.mxu0 %v2997_v8  ;;  %v3492_v61 = vand.u32 4294901760, %v2888_v54 }
 0x11b   :  { %1529 = vmatmul.mubr.f32.gmra.mxu1 %v1133_v12  ;;  %1673 = vmatprep.subr.mxu1 %v3476_v16 }
 0x11c   :  { %1402 = vmatprep.subr.mxu0 %v3476_v16  ;;  %1675 = vmatpush1.msra.mxu1 %v2716_v0  ;;  %v3494_v0 = vand.u32 4294901760, %v2934_v51 }
 0x11d   :  { %1811 = vmatprep.mubr.msk.f32.mxu1 %vm99_vm5, %v2801_v17  ;;  %1405 = vmatpush2.msra.mxu0 %v3009_v30 }
 0x11e   :  { %1676 = vmatprep.subr.mxu1 %v3476_v16  ;;  %1406 = vmatprep.subr.mxu0 %v3476_v16 }
 0x11f   :  { %1678 = vmatpush1.msra.mxu1 %v2736_v11  ;;  %1409 = vmatpush2.msra.mxu0 %v3019_v23  ;;  %v3496_v11 = vand.u32 4294901760, %v2971_v26 }
 0x120   :  { %1679 = vmatprep.subr.mxu1 %v3476_v16  ;;  %1415 = vmatmul.mubr.f32.vlgmr.msra.gmra.mxu0 %v3071_v43 }
 0x121   :  { %1534 = vmatprep.subr.mxu0 %v3476_v16  ;;  %1681 = vmatpush1.msra.mxu1 %v2751_v40  ;;  %v3498_v40 = vand.u32 4294901760, %v2997_v8 }
 0x122   :  { %1421 = vmatprep.mubr.f32.mxu0 %v3078_v46  ;;  %1538 = vmatpush1.msra.mxu0 %v1144_v31  ;;  %v3497_v31 = vand.u32 4294901760, %v2985_v41 }
 0x123   :  { %1682 = vmatprep.subr.mxu1 %v3476_v16  ;;  %1539 = vmatprep.subr.mxu0 %v3476_v16 }
 0x124   :  { %1684 = vmatpush1.msra.mxu1 %v2778_v32  ;;  %1543 = vmatpush1.msra.mxu0 %v1151_v50 }
 0x125   :  { %1685 = vmatprep.subr.mxu1 %v3476_v16  ;;  %1424 = vmatmul.mubr.f32.gmra.mxu0 %v3094_v36 }
 0x126   :  { %1544 = vmatprep.subr.mxu0 %v3476_v16  ;;  %1687 = vmatpush1.msra.mxu1 %v2795_v14 }
 0x127   :  { %1548 = vmatpush1.msra.mxu0 %v1158_v33  ;;  %1807 = vmatprep.mubr.msk.f32.mxu0 %vm99_vm5, %v2801_v17 }
 0x128   :  { %1688 = vmatprep.subr.mxu1 %v3476_v16  ;;  %1549 = vmatprep.subr.mxu0 %v3476_v16 }
 0x129   :  { %1690 = vmatpush1.msra.mxu1 %v2816_v57  ;;  %1553 = vmatpush1.msra.mxu0 %v1165_v19 }
 0x12a   :  { %1691 = vmatprep.subr.mxu1 %v3476_v16  ;;  %1554 = vmatprep.subr.mxu0 %v3476_v16 }
 0x12b   :  { %1693 = vmatpush1.msra.mxu1 %v2835_v10  ;;  %1558 = vmatpush1.msra.mxu0 %v1172_v63 }
 0x12c   :  { %1694 = vmatprep.subr.mxu1 %v3476_v16  ;;  %1559 = vmatprep.subr.mxu0 %v3476_v16 }
 0x12d   :  { %1696 = vmatpush1.msra.mxu1 %v2852_v48  ;;  %1563 = vmatpush1.msra.mxu0 %v1179_v47 }
 0x12e   :  { %1697 = vmatprep.subr.mxu1 %v3476_v16  ;;  %1564 = vmatprep.subr.mxu0 %v3476_v16 }
 0x12f   :  { %1699 = vmatpush1.msra.mxu1 %v2879_v9  ;;  %1568 = vmatpush1.msra.mxu0 %v1186_v27 }
 0x130   :  { %1700 = vmatprep.subr.mxu1 %v3476_v16  ;;  %1569 = vmatprep.subr.mxu0 %v3476_v16 }
 0x131   :  { %1702 = vmatpush1.msra.mxu1 %v2898_v44  ;;  %1573 = vmatpush1.msra.mxu0 %v1193_v15 }
 0x132   :  { %1703 = vmatprep.subr.mxu1 %v3476_v16  ;;  %1574 = vmatprep.subr.mxu0 %v3476_v16 }
 0x133   :  { %1705 = vmatpush1.msra.mxu1 %v2915_v2  ;;  %1578 = vmatpush1.msra.mxu0 %v3491_v24 }
 0x134   :  { %1706 = vmatprep.subr.mxu1 %v3476_v16  ;;  %1579 = vmatprep.subr.mxu0 %v3476_v16 }
 0x135   :  { %1708 = vmatpush1.msra.mxu1 %v2936_v45  ;;  %1583 = vmatpush1.msra.mxu0 %v3492_v61 }
 0x136   :  { %1709 = vmatprep.subr.mxu1 %v3476_v16  ;;  %1584 = vmatprep.subr.mxu0 %v3476_v16 }
 0x137   :  { %1711 = vmatpush1.msra.mxu1 %v2958_v58  ;;  %1588 = vmatpush1.msra.mxu0 %v3493_v62 }
 0x138   :  { %1712 = vmatprep.subr.mxu1 %v3476_v16  ;;  %1589 = vmatprep.subr.mxu0 %v3476_v16 }
 0x139   :  { %1714 = vmatpush1.msra.mxu1 %v2973_v55  ;;  %1593 = vmatpush1.msra.mxu0 %v3494_v0 }
 0x13a   :  { %1743 = vmatprep.subr.mxu1 %v3476_v16  ;;  %1594 = vmatprep.subr.mxu0 %v3476_v16 }
 0x13b   :  { %1745 = vmatpush2.msra.mxu1 %v2987_v7  ;;  %1598 = vmatpush1.msra.mxu0 %v3495_v4 }
 0x13c   :  { %1746 = vmatprep.subr.mxu1 %v3476_v16  ;;  %1599 = vmatprep.subr.mxu0 %v3476_v16 }
 0x13d   :  { %1748 = vmatpush2.msra.mxu1 %v2999_v49  ;;  %1603 = vmatpush1.msra.mxu0 %v3496_v11 }
 0x13e   :  { %1812 = vmatmul.mubr.msk.f32.vlgmr.msra.gmra.mxu1 %vm77_vm8, %v3447_v3  ;;  %1604 = vmatprep.subr.mxu0 %v3476_v16 }
 0x13f   :  { %1813 = vmatprep.mubr.msk.f32.mxu1 %vm99_vm5, %v3057_v21  ;;  %1608 = vmatpush1.msra.mxu0 %v3497_v31 }
 0x140   :  { %1609 = vmatprep.subr.mxu0 %v3476_v16  ;;  %v1885_v35 = vpop.f32.mrf.mxu1 }
 0x141   :  { %1613 = vmatpush1.msra.mxu0 %v3498_v40 }
 0x142   :  { %1814 = vmatmul.mubr.msk.f32.gmra.mxu1 %vm81_vm9, %v3447_v3  ;;  %1642 = vmatprep.subr.mxu0 %v3476_v16  ;;  %v1886_v50 = vpop.f32.mrf.mxu1 }
 0x143   :  { %1646 = vmatpush2.msra.mxu0 %v3499_v59  ;;  %v1887_v33 = vadd.f32 %v1886_v50, %v1885_v35 }
 0x144   :  { %1647 = vmatprep.subr.mxu0 %v3476_v16  ;;  %v1888_v32 = vpop.f32.mrf.mxu1 }
 0x145   :  { %1651 = vmatpush2.msra.mxu0 %v3500_v52 }
 0x146   :  { %1808 = vmatmul.mubr.msk.f32.vlgmr.msra.gmra.mxu0 %vm77_vm8, %v3447_v3  ;;  %v1889_v14 = vpop.f32.mrf.mxu1 }
 0x147   :  { %1809 = vmatprep.mubr.msk.f32.mxu0 %vm99_vm5, %v3057_v21  ;;  %v1890_v17 = vadd.f32 %v1889_v14, %v1888_v32 }
 0x149   :  { %v1847_v19 = vpop.f32.mrf.mxu0 }
 0x14a   :  { %1810 = vmatmul.mubr.msk.f32.gmra.mxu0 %vm81_vm9, %v3447_v3 }
 0x14b   :  { %v1848_v16 = vpop.f32.mrf.mxu0 }
 0x14c   :  { %v1849_v25 = vadd.f32 %v1848_v16, %v1847_v19 }
 0x14e   :  { %v466_v57 = vadd.f32 %v1887_v33, %v1849_v25  ;;  %v1850_v63 = vpop.f32.mrf.mxu0 }
 0x150   :  { %v1851_v5 = vpop.f32.mrf.mxu0 }
 0x151   :  { %v1852_v10 = vadd.f32 %v1851_v5, %v1850_v63 }
 0x153   :  { %v473_v47 = vadd.f32 %v1890_v17, %v1852_v10 }
 0x162   :  { %v1961_v39 = vpop.f32.mrf.mxu1 }
 0x164   :  { %v1962_v34 = vpop.f32.mrf.mxu1 }
 0x165   :  { %v1963_v48 = vadd.f32 %v1962_v34, %v1961_v39 }
 0x167   :  { %v1964_v37 = vpop.f32.mrf.mxu1 }
 0x169   :  { %v1965_v27 = vpop.f32.mrf.mxu1 }
 0x16a   :  { %v1966_v56 = vadd.f32 %v1965_v27, %v1964_v37 }
 0x16c   :  { %v1923_v9 = vpop.f32.mrf.mxu0 }
 0x16e   :  { %v1924_v15 = vpop.f32.mrf.mxu0 }
 0x16f   :  { %v1925_v54 = vadd.f32 %v1924_v15, %v1923_v9 }
 0x171   :  { %v611_v44 = vadd.f32 %v1925_v54, %v466_v57  ;;  %v1926_v30 = vpop.f32.mrf.mxu0 }
 0x173   :  { %v1927_v13 = vpop.f32.mrf.mxu0  ;;  %v728_v3 = vadd.f32 %v1963_v48, %v611_v44 }
 0x174   :  { %v1928_v1 = vadd.f32 %v1927_v13, %v1926_v30 }
 0x176   :  { %v620_v2 = vadd.f32 %v1928_v1, %v473_v47 }
 0x178   :  { %v739_v7 = vadd.f32 %v1966_v56, %v620_v2 }
 0x186   :  { %v2037_v51 = vpop.f32.mrf.mxu1 }
 0x188   :  { %v2038_v45 = vpop.f32.mrf.mxu1 }
 0x189   :  { %v2039_v8 = vadd.f32 %v2038_v45, %v2037_v51 }
 0x18b   :  { %v2040_v42 = vpop.f32.mrf.mxu1 }
 0x18d   :  { %v2041_v58 = vpop.f32.mrf.mxu1 }
 0x18e   :  { %v2042_v60 = vadd.f32 %v2041_v58, %v2040_v42 }
 0x190   :  { %v1999_v26 = vpop.f32.mrf.mxu0 }
 0x192   :  { %v2000_v55 = vpop.f32.mrf.mxu0 }
 0x193   :  { %v2001_v23 = vadd.f32 %v2000_v55, %v1999_v26 }
 0x195   :  { %v907_v41 = vadd.f32 %v2001_v23, %v728_v3  ;;  %v2002_v20 = vpop.f32.mrf.mxu0 }
 0x197   :  { %v2003_v49 = vpop.f32.mrf.mxu0  ;;  %v1018_v18 = vadd.f32 %v2039_v8, %v907_v41 }
 0x198   :  { %v2004_v43 = vadd.f32 %v2003_v49, %v2002_v20 }
 0x19a   :  { %v914_v21 = vadd.f32 %v2004_v43, %v739_v7 }
 0x19c   :  { %v1025_v46 = vadd.f32 %v2042_v60, %v914_v21 }
 0x1ae   :  { %v1299_v28 = vpop.f32.mrf.mxu1 }
 0x1b0   :  { %v1301_v36 = vpop.f32.mrf.mxu1 }
 0x1b3   :  { %v1306_v6 = vpop.f32.mrf.mxu1 }
 0x1b5   :  { %v1308_v38 = vpop.f32.mrf.mxu1 }
 0x1b8   :  { %v1122_v12 = vpop.f32.mrf.mxu0 }
 0x1b9   :  { %v1123_v29 = vadd.f32 %v1122_v12, %v1018_v18 }
 0x1ba   :  { %v1124_v53 = vpop.f32.mrf.mxu0 }
 0x1bb   :  { %v1300_v22 = vadd.f32 %v1299_v28, %v1123_v29 }
 0x1bd   :  { %v1137_v24 = vpop.f32.mrf.mxu0 }
 0x1be   :  { %v1138_v61 = vadd.f32 %v1137_v24, %v1025_v46 }
 0x1bf   :  { %v1139_v62 = vpop.f32.mrf.mxu0 }
 0x1c0   :  { %v1307_v0 = vadd.f32 %v1306_v6, %v1138_v61 }
 0x1d6   :  { %v1519_v4 = vpop.f32.mrf.mxu1 }
 0x1d8   :  { %v1521_v11 = vpop.f32.mrf.mxu1 }
 0x1db   :  { %v1530_v31 = vpop.f32.mrf.mxu1 }
 0x1dd   :  { %v1532_v35 = vpop.f32.mrf.mxu1 }
 0x1e0   :  { %v1416_v40 = vpop.f32.mrf.mxu0 }
 0x1e1   :  { %v1417_v14 = vadd.f32 %v1416_v40, %v1300_v22 }
 0x1e2   :  { %v1418_v50 = vpop.f32.mrf.mxu0 }
 0x1e3   :  { %v1520_v25 = vadd.f32 %v1519_v4, %v1417_v14 }
 0x1e5   :  { %v1425_v59 = vpop.f32.mrf.mxu0 }
 0x1e6   :  { %v1426_v16 = vadd.f32 %v1425_v59, %v1307_v0 }
 0x1e7   :  { %v1427_v33 = vpop.f32.mrf.mxu0 }
 0x1e8   :  { %v1531_v47 = vadd.f32 %v1530_v31, %v1426_v16 }
 0x1fe   :  { %v1753_v32 = vpop.f32.mrf.mxu1 }
 0x200   :  { %v1755_v52 = vpop.f32.mrf.mxu1 }
 0x202   :  { %v1760_v17 = vpop.f32.mrf.mxu1 }
 0x204   :  { %v1762_v19 = vpop.f32.mrf.mxu1 }
 0x206   :  { %v1656_v57 = vpop.f32.mrf.mxu0 }
 0x207   :  { %v1657_v63 = vadd.f32 %v1656_v57, %v1520_v25 }
 0x208   :  { %v1658_v5 = vpop.f32.mrf.mxu0 }
 0x209   :  { %v1754_v10 = vadd.f32 %v1753_v32, %v1657_v63 }
 0x20a   :  { %v1663_v39 = vpop.f32.mrf.mxu0 }
 0x20b   :  { %1765 = vst.msk [vmem:[#allocation2] sm:$0xff] %vm1764_vm10, %v1754_v10  ;;  %v1664_v34 = vadd.f32 %v1663_v39, %v1531_v47 }
 0x20c   :  { %v1665_v48 = vpop.f32.mrf.mxu0 }
 0x20d   :  { %v1761_v37 = vadd.f32 %v1760_v17, %v1664_v34 }
 0x20f   :  { %1766 = vst.msk [vmem:[#allocation2 + $0x8] sm:$0xff] %vm1764_vm10, %v1761_v37 }
 0x210   :  { %2061 = shalt.err (!%p2058_p4)
}
 0x211   :  { %s2076_s28 = smov 128   ;;  %s2077_s0 = smov 8  }
 0x212   :  { %1778 = dma.vmem_to_hbm [thread:$0]  %s1773_s26, 256, %s3320_s2, [#allocation3], %s2076_s28, %s2076_s28, %s2077_s0  }
 0x213   :  { %2070 = dma.done.wait [#allocation3], 256  }
 0x214   :  { %2071 = vsyncadd [#allocation3], 4294967040 }
 0x215   :  { %1782 = vsyncpa [#allocation3], 1 }

</bundles_post_ra>
